<compile_context>
chip_gen: v7x
topology: tpu7x:2x2x1
jax: 0.10.0
libtpu: 0.0.40
codegen_flags: <defaults>
</compile_context>

<pallas_src>
import math

import jax
import jax.numpy as jnp
from jax.experimental import pallas as pl
from jax.experimental.pallas import tpu as pltpu


# ----------------------------------------------------------------------------
# Fused kernels (one grid step == one chunk of B images, batch folded on lanes)
# ----------------------------------------------------------------------------
def _transition_pool_kernel(x_ref, w_ref, b_ref, p_ref, o_ref):
    # x_ref: (Cin, L)    bf16   activations, L = B*HW lanes (chunk of B images)
    # w_ref: (Cout, Cin) bf16   1x1 conv weight with BN scale pre-folded
    # b_ref: (Cout, 1)   f32    folded BN bias
    # p_ref: (L, Lo)     bf16   constant block-diagonal 0/0.25 avg-pool matrix
    # o_ref: (Cout, Lo)  f32    Lo = B*HWo lanes
    z = jnp.dot(w_ref[...], x_ref[...], preferred_element_type=jnp.float32)   # (Cout, L)
    z = jnp.maximum(z + b_ref[...], 0.0)                                      # BN bias + ReLU
    pooled = jnp.dot(z.astype(jnp.bfloat16), p_ref[...],                      # bf16 MXU pool
                     preferred_element_type=jnp.float32)                      # (Cout, Lo)
    o_ref[...] = pooled.astype(o_ref.dtype)


def _transition_nopool_kernel(x_ref, w_ref, b_ref, o_ref):
    z = jnp.dot(w_ref[...], x_ref[...], preferred_element_type=jnp.float32)   # (Cout, L)
    o_ref[...] = jnp.maximum(z + b_ref[...], 0.0).astype(o_ref.dtype)


# ----------------------------------------------------------------------------
# Batch-chunk selection: lane-dense output (>=128), big-ish input slab,
# pool-matrix VMEM budget (matters on v7x's 64 MiB VMEM at large spatial sizes).
# ----------------------------------------------------------------------------
def _pick_batch_chunk(N, HW, HWo, pool_elem_bytes, pool_budget=8 << 20):
    want = max(-(-128 // HWo), -(-1024 // HW), 1)
    best = 1
    for d in range(1, N + 1):
        if N % d:
            continue
        pool_bytes = (d * HW) * (d * HWo) * pool_elem_bytes
        if pool_bytes > pool_budget:
            break
        best = d
        if d >= want:
            break
    return best


# ----------------------------------------------------------------------------
# Wrapper
# ----------------------------------------------------------------------------
def transition_block(x, params, *, with_pooling=True):
    """x: (N, Cin, H, W) float32 (NCHW, like PyTorch). Returns NCHW float32."""
    N, Cin, H, W = x.shape
    w = params["w"]                                   # (Cout, Cin)  1x1 conv weight
    Cout = w.shape[0]
    scale = params["scale"].astype(jnp.float32)       # folded BN scale
    bias = params["bias"].reshape(Cout, 1).astype(jnp.float32)

    # Fold BN scale into the weight, then cast to bf16 for the MXU.
    w_bf = (w.astype(jnp.float32) * scale[:, None]).astype(jnp.bfloat16)

    HW = H * W
    # Lane-dense layout: (Cin, N*HW) — batch folded onto the 128-lane axis.
    x_flat = x.transpose(1, 0, 2, 3).reshape(Cin, N * HW).astype(jnp.bfloat16)

    if with_pooling:
        assert H % 2 == 0 and W % 2 == 0, "AvgPool2d(2,2) needs even H, W"
        Ho, Wo = H // 2, W // 2
        HWo = Ho * Wo

        B = _pick_batch_chunk(N, HW, HWo, pool_elem_bytes=2)
        L, Lo = B * HW, B * HWo
        steps = N // B

        # Per-image avg-pool matrix: P[h*W+w, ho*Wo+wo] = 0.25 iff (h//2, w//2)==(ho, wo)
        hw = jnp.arange(HW)
        pooled_idx = (hw // W // 2) * Wo + (hw % W) // 2
        pmat = (pooled_idx[:, None] == jnp.arange(HWo)[None, :]).astype(jnp.float32) * 0.25
        # Block-diagonal over the B images of a chunk (same matrix for every chunk).
        pool_bd = jnp.kron(jnp.eye(B, dtype=jnp.float32), pmat).astype(jnp.bfloat16)

        flops = 2 * Cout * Cin * N * HW + 2 * Cout * L * Lo * steps
        bytes_accessed = (x_flat.size * 2 + w_bf.size * 2 + bias.size * 4
                          + pool_bd.size * 2 + Cout * N * HWo * 4)

        # Raise the scoped VMEM limit only if the blocks actually need it.
        vmem_need = (2 * (Cin * L * 2 + Cout * Lo * 4)          # double-buffered x / out
                     + pool_bd.size * 2 + w_bf.size * 2 + bias.size * 4)
        cp_kwargs = dict(dimension_semantics=("parallel",))
        if vmem_need > (24 << 20):
            cp_kwargs["vmem_limit_bytes"] = min(2 * vmem_need, 60 << 20)

        out = pl.pallas_call(
            _transition_pool_kernel,
            out_shape=jax.ShapeDtypeStruct((Cout, N * HWo), jnp.float32),
            grid=(steps,),
            in_specs=[
                pl.BlockSpec((Cin, L), lambda g: (0, g)),       # per-chunk activations
                pl.BlockSpec((Cout, Cin), lambda g: (0, 0)),    # weight: VMEM-resident
                pl.BlockSpec((Cout, 1), lambda g: (0, 0)),      # bias:   VMEM-resident
                pl.BlockSpec((L, Lo), lambda g: (0, 0)),        # pool matrix: resident
            ],
            out_specs=pl.BlockSpec((Cout, Lo), lambda g: (0, g)),
            compiler_params=pltpu.CompilerParams(**cp_kwargs),
            cost_estimate=pl.CostEstimate(flops=flops, transcendentals=0,
                                          bytes_accessed=bytes_accessed),
        )(x_flat, w_bf, bias, pool_bd)
        # (Cout, N*HWo) -> (N, Cout, Ho, Wo)
        return out.reshape(Cout, N, Ho, Wo).transpose(1, 0, 2, 3)

    # ---- no-pooling path ----
    B = _pick_batch_chunk(N, HW, HW, pool_elem_bytes=0)
    L = B * HW
    steps = N // B

    flops = 2 * Cout * Cin * N * HW
    bytes_accessed = (x_flat.size * 2 + w_bf.size * 2 + bias.size * 4
                      + Cout * N * HW * 4)
    out = pl.pallas_call(
        _transition_nopool_kernel,
        out_shape=jax.ShapeDtypeStruct((Cout, N * HW), jnp.float32),
        grid=(steps,),
        in_specs=[
            pl.BlockSpec((Cin, L), lambda g: (0, g)),
            pl.BlockSpec((Cout, Cin), lambda g: (0, 0)),
            pl.BlockSpec((Cout, 1), lambda g: (0, 0)),
        ],
        out_specs=pl.BlockSpec((Cout, L), lambda g: (0, g)),
        compiler_params=pltpu.CompilerParams(dimension_semantics=("parallel",)),
        cost_estimate=pl.CostEstimate(flops=flops, transcendentals=0,
                                      bytes_accessed=bytes_accessed),
    )(x_flat, w_bf, bias)
    return out.reshape(Cout, N, H, W).transpose(1, 0, 2, 3)


# ----------------------------------------------------------------------------
# Parameter init (deterministic, synthetic): 1x1 conv (no bias) + eval-mode BN
# folded into per-channel scale/bias.  MaskedConv2d mask == identity, folded.
# ----------------------------------------------------------------------------
def init_transition_block(key, inp, oup):
    k1, k2, k3, k4, k5 = jax.random.split(key, 5)
    w = jax.random.normal(k1, (oup, inp), jnp.float32) / math.sqrt(inp)
    gamma = 1.0 + 0.1 * jax.random.normal(k2, (oup,), jnp.float32)
    beta = 0.1 * jax.random.normal(k3, (oup,), jnp.float32)
    mean = 0.1 * jax.random.normal(k4, (oup,), jnp.float32)
    var = jax.nn.softplus(jax.random.normal(k5, (oup,), jnp.float32)) + 0.5
    eps = 1e-5
    scale = gamma / jnp.sqrt(var + eps)
    bias = beta - mean * scale
    return {"w": w, "scale": scale, "bias": bias}


# ----------------------------------------------------------------------------
# Pure-JAX reference (mirrors the kernel's bf16 rounding points exactly)
# ----------------------------------------------------------------------------
def _ref_transition_block(x, params, *, with_pooling=True):
    xb = x.astype(jnp.bfloat16)
    w_s = (params["w"] * params["scale"][:, None]).astype(jnp.bfloat16)   # BN scale folded
    z = jnp.einsum("nchw,oc->nohw", xb, w_s, preferred_element_type=jnp.float32)
    z = jnp.maximum(z + params["bias"][None, :, None, None], 0.0)
    if with_pooling:
        zb = z.astype(jnp.bfloat16).astype(jnp.float32)   # kernel pools a bf16 z
        n, c, h, w = zb.shape
        z = zb.reshape(n, c, h // 2, 2, w // 2, 2).mean(axis=(3, 5))
    return z


if __name__ == "__main__":
    # Small shapes: N=2, inp=4 channels, 16x16 spatial, oup=8.
    N, Cin, H, W = 2, 4, 16, 16
    Cout = 8

    key = jax.random.PRNGKey(0)
    kx, kp = jax.random.split(key)
    x = jax.random.normal(kx, (N, Cin, H, W), jnp.float32)        # NCHW input
    params = init_transition_block(kp, Cin, Cout)

    # with_pooling=True (default TransitionBlock path)
    out = jax.block_until_ready(transition_block(x, params, with_pooling=True))
    assert out.shape == (N, Cout, H // 2, W // 2), out.shape
    ref = jax.block_until_ready(_ref_transition_block(x, params, with_pooling=True))
    if not jnp.allclose(out, ref, atol=1e-3, rtol=1e-3):
        raise AssertionError("Pallas TransitionBlock (pooling) mismatch vs reference")

    # with_pooling=False path
    out2 = jax.block_until_ready(transition_block(x, params, with_pooling=False))
    assert out2.shape == (N, Cout, H, W), out2.shape
    ref2 = jax.block_until_ready(_ref_transition_block(x, params, with_pooling=False))
    if not jnp.allclose(out2, ref2, atol=1e-3, rtol=1e-3):
        raise AssertionError("Pallas TransitionBlock (no pooling) mismatch vs reference")

    print("KERNEL_OK")
</pallas_src>

<mosaic_0001>
module attributes {stable_mosaic.version = 11 : i64} {
  func.func @_transition_pool_kernel(%arg0: i32, %arg1: memref<4x512xbf16, #tpu.memory_space<vmem>>, %arg2: memref<8x4xbf16, #tpu.memory_space<vmem>>, %arg3: memref<8x1xf32, #tpu.memory_space<vmem>>, %arg4: memref<512x128xbf16, #tpu.memory_space<vmem>>, %arg5: memref<8x128xf32, #tpu.memory_space<vmem>>) attributes {dimension_semantics = [#tpu.dimension_semantics<parallel>], iteration_bounds = array<i64: 1>, scalar_prefetch = 0 : i64, scratch_operands = 0 : i64, tpu.core_type = #tpu.core_type<tc>, window_params = [{transform_indices = @transform_0, window_bounds = array<i64: 4, 512>}, {pipeline_mode = #tpu.pipeline_mode<synchronous>, transform_indices = @transform_1, window_bounds = array<i64: 8, 4>}, {pipeline_mode = #tpu.pipeline_mode<synchronous>, transform_indices = @transform_2, window_bounds = array<i64: 8, 1>}, {pipeline_mode = #tpu.pipeline_mode<synchronous>, transform_indices = @transform_3, window_bounds = array<i64: 512, 128>}, {transform_indices = @transform_4, window_bounds = array<i64: 8, 128>}]} {
    %c0 = arith.constant 0 : index
    %c0_0 = arith.constant 0 : index
    %0 = vector.load %arg2[%c0, %c0_0] : memref<8x4xbf16, #tpu.memory_space<vmem>>, vector<8x4xbf16>
    %c0_1 = arith.constant 0 : index
    %c0_2 = arith.constant 0 : index
    %1 = vector.load %arg1[%c0_1, %c0_2] : memref<4x512xbf16, #tpu.memory_space<vmem>>, vector<4x512xbf16>
    %cst = arith.constant dense<0.000000e+00> : vector<8x512xf32>
    %2 = tpu.matmul %0, %1, %cst {dimension_numbers = #tpu.dot_dimension_numbers<[1], [0], [0], [1], [0, 0, 1, 1], [], []>} : vector<8x4xbf16>, vector<4x512xbf16>, vector<8x512xf32> -> vector<8x512xf32>
    %c0_3 = arith.constant 0 : index
    %c0_4 = arith.constant 0 : index
    %3 = vector.load %arg3[%c0_3, %c0_4] : memref<8x1xf32, #tpu.memory_space<vmem>>, vector<8x1xf32>
    %4 = vector.broadcast %3 : vector<8x1xf32> to vector<8x512xf32>
    %5 = arith.addf %2, %4 : vector<8x512xf32>
    %cst_5 = arith.constant 0.000000e+00 : f32
    %6 = vector.broadcast %cst_5 : f32 to vector<8x512xf32>
    %7 = arith.maximumf %5, %6 : vector<8x512xf32>
    %8 = arith.truncf %7 : vector<8x512xf32> to vector<8x512xbf16>
    %c0_6 = arith.constant 0 : index
    %c0_7 = arith.constant 0 : index
    %9 = vector.load %arg4[%c0_6, %c0_7] : memref<512x128xbf16, #tpu.memory_space<vmem>>, vector<512x128xbf16>
    %cst_8 = arith.constant dense<0.000000e+00> : vector<8x128xf32>
    %10 = tpu.matmul %8, %9, %cst_8 {dimension_numbers = #tpu.dot_dimension_numbers<[1], [0], [0], [1], [0, 0, 1, 1], [], []>} : vector<8x512xbf16>, vector<512x128xbf16>, vector<8x128xf32> -> vector<8x128xf32>
    %c0_9 = arith.constant 0 : index
    %c0_10 = arith.constant 0 : index
    %11 = vector.load %arg5[%c0_9, %c0_10] : memref<8x128xf32, #tpu.memory_space<vmem>>, vector<8x128xf32>
    tpu.vector_store %arg5[%c0_9, %c0_10], %10 {strides = array<i32>} : memref<8x128xf32, #tpu.memory_space<vmem>>, vector<8x128xf32>,
    return
  }
  func.func @transform_0(%arg0: i32) -> (i32, i32) {
    %c0_i32 = arith.constant 0 : i32
    %c0_i32_0 = arith.constant 0 : i32
    return %c0_i32, %arg0 : i32, i32
  }
  func.func @transform_1(%arg0: i32) -> (i32, i32) {
    %c0_i32 = arith.constant 0 : i32
    %c0_i32_0 = arith.constant 0 : i32
    %c0_i32_1 = arith.constant 0 : i32
    return %c0_i32, %c0_i32_0 : i32, i32
  }
  func.func @transform_2(%arg0: i32) -> (i32, i32) {
    %c0_i32 = arith.constant 0 : i32
    %c0_i32_0 = arith.constant 0 : i32
    %c0_i32_1 = arith.constant 0 : i32
    return %c0_i32, %c0_i32_0 : i32, i32
  }
  func.func @transform_3(%arg0: i32) -> (i32, i32) {
    %c0_i32 = arith.constant 0 : i32
    %c0_i32_0 = arith.constant 0 : i32
    %c0_i32_1 = arith.constant 0 : i32
    return %c0_i32, %c0_i32_0 : i32, i32
  }
  func.func @transform_4(%arg0: i32) -> (i32, i32) {
    %c0_i32 = arith.constant 0 : i32
    %c0_i32_0 = arith.constant 0 : i32
    return %c0_i32, %arg0 : i32, i32
  }
}

</mosaic_0001>

<bundles_post_ra>
// kernel: tpu_custom_call.1
= control target key start
LH: loop header
LB: loop body
LE: loop exit
PB: predicated region body
PF: predicated region fallthrough
CT: control target
= control target key end

     0   :  { %9 = vsyncpa [#allocation3], 0  ;;  %s754_s0 = inlined_call_operand.vmem [shape: bf16[4,512], index: 0, kind: input, shape index: {}]   ;;  %s755_s1 = inlined_call_operand.vmem [shape: bf16[8,4], index: 1, kind: input, shape index: {}]   ;;  %s756_s2 = inlined_call_operand.vmem [shape: f32[8,1], index: 2, kind: input, shape index: {}]   ;;  %s757_s3 = inlined_call_operand.hbm [shape: bf16[512,128], index: 3, kind: input, shape index: {}]   ;;  %s758_s4 = inlined_call_operand.hbm [shape: f32[8,128], index: 4, kind: output, shape index: {}]  }
   0x1   :  { %10 = vsyncpa [#allocation4], 0  ;;  %s686_s15 = smov [#allocation2]   ;;  %s638_s19 = scalar_lea.hbm %s757_s3, 4096 }
   0x2   :  { %s22_s16 = sshll.u32 %s686_s15, 4  ;;  %p639_p0 = scmp.ne.s32.totalorder %s757_s3, %s638_s19  ;;  %s23_s16 = int_to_ptr.vmem [resolvable:$true] %s22_s16 }
   0x3   :  { %p642_p1 = scmp.lt.u32.totalorder %s638_s19, %s757_s3 }
   0x5   :  { %p644_p2 = pnand %p642_p1, %p639_p0 }
   0x7   :  { %647 = shalt.err (!%p644_p2)
}
   0x8   :  { %s648_s24 = scalar_lea.vmem %s23_s16, 4096  ;;  %p653_p4 = scmp.lt.s32.totalorder %s23_s16, %s23_s16 }
   0x9   :  { %p649_p3 = scmp.ne.s32.totalorder %s23_s16, %s648_s24  ;;  %p654_p5 = scmp.lt.s32.totalorder %s648_s24, %s648_s24 }
   0xb   :  { %p655_p6 = por %p654_p5, %p653_p4 }
   0xd   :  { %p656_p7 = pnand %p655_p6, %p649_p3 }
   0xf   :  { %659 = shalt.err (!%p656_p7)
}
  0x10   :  { %s687_s25 = smov 64   ;;  %s688_s26 = smov 4  }
  0x11   :  { %28 = dma.hbm_to_vmem [thread:$0]  %s757_s3, 4096, %s23_s16, [#allocation3], %s687_s25, %s687_s25, %s688_s26  }
  0x12   :  { %682 = dma.done.wait [#allocation3], 4096  }
  0x13   :  { %683 = vsyncadd [#allocation3], 4294963200  ;;  %v46_v0 = vlaneseq  ;;  %v689_v1 = vmov 1983009808   ;;  %v690_v3 = vmov 0   ;;  %v34_v7 = vld [vmem:[%s754_s0] sm:$0xff] }
  0x14   :  { %v44_v2 = vunpack.c.l.s4 %v689_v1  ;;  %108 = vmatprep.mubr.bf16.mxu0 %v690_v3  ;;  %149 = vmatprep.mubr.bf16.mxu1 %v690_v3  ;;  %vm63_vm0 = vcmask 1041408   ;;  %v35_v8 = vld [vmem:[%s756_s2] sm:$0xff]  ;;  %v42_v10 = vcombine.high %v34_v7, %v34_v7  ;;  %vm59_vm1 = vcmask 31744   ;;  %v610_v21 = vld [vmem:[#allocation2 + $0x48] sm:$0xff]   ;;  %v614_v25 = vld [vmem:[#allocation2 + $0x50] sm:$0xff]   ;;  %s691_s0 = smov [#allocation5]  }
  0x15   :  { %v47_v4 = vshrl.u32 %v46_v0, 7  ;;  %604 = vset.pattern.permute.xlu0 %v690_v3  ;;  %v606_v14 = vld [vmem:[#allocation2 + $0x40] sm:$0xff]   ;;  %v611_v22 = vld [vmem:[#allocation2 + $0x8] sm:$0xff]   ;;  %v615_v26 = vld [vmem:[#allocation2 + $0x10] sm:$0xff]  }
  0x16   :  { %v45_v5 = vunpack.c.0.s8 %v44_v2  ;;  %38 = vperm.xlu0 %604, %v35_v8   ;;  %v33_v15 = vld [vmem:[%s755_s1] sm:$0xf]  ;;  %v612_v23 = vld [vmem:[#allocation2 + $0xc8] sm:$0xff]   ;;  %v616_v27 = vld [vmem:[#allocation2 + $0xd0] sm:$0xff]   ;;  %s509_s1 = sshll.u32 %s691_s0, 4  ;;  %s510_s1 = int_to_ptr.vmem [resolvable:$true] %s509_s1 }
  0x17   :  { %v607_v16 = vld [vmem:[#allocation2] sm:$0xff]   ;;  %v613_v24 = vld [vmem:[#allocation2 + $0x88] sm:$0xff]   ;;  %v617_v28 = vld [vmem:[#allocation2 + $0x90] sm:$0xff]   ;;  %s660_s2 = scalar_lea.vmem %s510_s1, 128  ;;  %p665_p9 = scmp.lt.s32.totalorder %s510_s1, %s510_s1 }
  0x18   :  { %v48_v6 = vsub.s32 %v45_v5, %v47_v4  ;;  %v608_v19 = vld [vmem:[#allocation2 + $0xc0] sm:$0xff]   ;;  %v618_v29 = vld [vmem:[#allocation2 + $0x58] sm:$0xff]   ;;  %v626_v37 = vld [vmem:[#allocation2 + $0x68] sm:$0xff]   ;;  %p661_p8 = scmp.ne.s32.totalorder %s510_s1, %s660_s2  ;;  %p666_p10 = scmp.lt.s32.totalorder %s660_s2, %s660_s2 }
  0x19   :  { %v609_v20 = vld [vmem:[#allocation2 + $0x80] sm:$0xff]   ;;  %v619_v30 = vld [vmem:[#allocation2 + $0x18] sm:$0xff]   ;;  %v628_v38 = vld [vmem:[#allocation2 + $0xe8] sm:$0xff]  }
  0x1a   :  { %v49_v9 = vrot.slane %v34_v7, %v48_v6  ;;  %v56_v13 = vrot.slane %v42_v10, %v48_v6  ;;  %v620_v31 = vld [vmem:[#allocation2 + $0xd8] sm:$0xff]   ;;  %v622_v33 = vld [vmem:[#allocation2 + $0x60] sm:$0xff]   ;;  %v627_v39 = vld [vmem:[#allocation2 + $0x28] sm:$0xff]   ;;  %p667_p11 = por %p666_p10, %p665_p9 }
  0x1b   :  { %v621_v32 = vld [vmem:[#allocation2 + $0x98] sm:$0xff]   ;;  %v623_v34 = vld [vmem:[#allocation2 + $0x20] sm:$0xff]   ;;  %v629_v40 = vld [vmem:[#allocation2 + $0xa8] sm:$0xff]  }
  0x1c   :  { %v57_v11 = vcombine.high %v49_v9, %v49_v9  ;;  %v65_v12 = vsel %vm63_vm0, %v49_v9, 0  ;;  %v58_v17 = vcombine.high %v56_v13, %v56_v13  ;;  %v71_v18 = vsel %vm63_vm0, %v56_v13, 0  ;;  %v624_v35 = vld [vmem:[#allocation2 + $0xe0] sm:$0xff]   ;;  %v630_v41 = vld [vmem:[#allocation2 + $0x70] sm:$0xff]   ;;  %v634_v45 = vld [vmem:[#allocation2 + $0x78] sm:$0xff]   ;;  %p668_p12 = pnand %p667_p11, %p661_p8 }
  0x1d   :  { %v625_v36 = vld [vmem:[#allocation2 + $0xa0] sm:$0xff]   ;;  %v631_v42 = vld [vmem:[#allocation2 + $0x30] sm:$0xff]   ;;  %v635_v46 = vld [vmem:[#allocation2 + $0x38] sm:$0xff]  }
  0x1e   :  { %518 = vmatprep.subr.msk.bf16.mxu0 %vm63_vm0, %v57_v11  ;;  %520 = vmatprep.subr.msk.bf16.mxu1 %vm63_vm0, %v58_v17  ;;  %v632_v43 = vld [vmem:[#allocation2 + $0xf0] sm:$0xff]   ;;  %v636_v47 = vld [vmem:[#allocation2 + $0xf8] sm:$0xff]  }
  0x1f   :  { %77 = vmatpush1.bf16.msra.mxu0 %v65_v12  ;;  %118 = vmatpush1.bf16.msra.mxu1 %v71_v18  ;;  %v633_v44 = vld [vmem:[#allocation2 + $0xb0] sm:$0xff]   ;;  %v637_v48 = vld [vmem:[#allocation2 + $0xb8] sm:$0xff]  }
  0x20   :  { %554 = vmatprep.subr.bf16.mxu0 %v606_v14  ;;  %576 = vmatprep.subr.bf16.mxu1 %v608_v19 }
  0x22   :  { %519 = vmatmul.mubr.msk.bf16.vlgmr.msra.gmra.mrb[0].mxu0 %vm59_vm1, %v33_v15  ;;  %521 = vmatmul.mubr.msk.bf16.vlgmr.msra.gmra.mrb[0].mxu1 %vm59_vm1, %v33_v15 }
  0x23   :  { %555 = vmatpush3.bf16.msra.mxu0 %v607_v16  ;;  %577 = vmatpush3.bf16.msra.mxu1 %v609_v20 }
  0x24   :  { %556 = vmatprep.subr.bf16.mxu0 %v610_v21  ;;  %578 = vmatprep.subr.bf16.mxu1 %v612_v23 }
  0x27   :  { %557 = vmatpush3.bf16.msra.mxu0 %v611_v22  ;;  %579 = vmatpush3.bf16.msra.mxu1 %v613_v24 }
  0x28   :  { %558 = vmatprep.subr.bf16.mxu0 %v614_v25  ;;  %580 = vmatprep.subr.bf16.mxu1 %v616_v27 }
  0x2b   :  { %559 = vmatpush3.bf16.msra.mxu0 %v615_v26  ;;  %581 = vmatpush3.bf16.msra.mxu1 %v617_v28 }
  0x2c   :  { %560 = vmatprep.subr.bf16.mxu0 %v618_v29  ;;  %582 = vmatprep.subr.bf16.mxu1 %v620_v31 }
  0x2f   :  { %561 = vmatpush3.bf16.msra.mxu0 %v619_v30  ;;  %583 = vmatpush3.bf16.msra.mxu1 %v621_v32 }
  0x30   :  { %562 = vmatprep.subr.bf16.mxu0 %v622_v33  ;;  %584 = vmatprep.subr.bf16.mxu1 %v624_v35 }
  0x33   :  { %563 = vmatpush3.bf16.msra.mxu0 %v623_v34  ;;  %585 = vmatpush3.bf16.msra.mxu1 %v625_v36 }
  0x34   :  { %564 = vmatprep.subr.bf16.mxu0 %v626_v37  ;;  %586 = vmatprep.subr.bf16.mxu1 %v628_v38 }
  0x37   :  { %565 = vmatpush3.bf16.msra.mxu0 %v627_v39  ;;  %587 = vmatpush3.bf16.msra.mxu1 %v629_v40 }
  0x38   :  { %566 = vmatprep.subr.bf16.mxu0 %v630_v41  ;;  %588 = vmatprep.subr.bf16.mxu1 %v632_v43 }
  0x3b   :  { %567 = vmatpush3.bf16.msra.mxu0 %v631_v42  ;;  %589 = vmatpush3.bf16.msra.mxu1 %v633_v44 }
  0x3c   :  { %568 = vmatprep.subr.bf16.mxu0 %v634_v45  ;;  %590 = vmatprep.subr.bf16.mxu1 %v636_v47 }
  0x3f   :  { %569 = vmatpush3.bf16.msra.mxu0 %v635_v46  ;;  %591 = vmatpush3.bf16.msra.mxu1 %v637_v48 }
  0x95   :  { %v39_v49 = vpop.permute.xlu0 %38 }
  0xf5   :  { %v110_v50 = vpop.f32.mrb[0].mxu0  ;;  %v151_v55 = vpop.f32.mrb[0].mxu1 }
  0xf6   :  { %v111_v51 = vadd.f32 %v110_v50, %v39_v49  ;;  %v112_v52 = vpop.f32.mrb[1].mxu0  ;;  %v152_v57 = vadd.f32 %v151_v55, %v39_v49  ;;  %v153_v59 = vpop.f32.mrb[1].mxu1 }
  0xf7   :  { %v113_v53 = vadd.f32 %v112_v52, %v39_v49  ;;  %v114_v54 = vpop.f32.mrb[2].mxu0  ;;  %v154_v61 = vadd.f32 %v153_v59, %v39_v49  ;;  %v155_v62 = vpop.f32.mrb[2].mxu1 }
  0xf8   :  { %v158_v56 = vmax.f32 %v111_v51, 0.0  ;;  %v115_v58 = vpop.f32.mrb[3].mxu0  ;;  %v160_v0 = vmax.f32 %v152_v57, 0.0  ;;  %v156_v1 = vpop.f32.mrb[3].mxu1 }
  0xf9   :  { %v159_v60 = vmax.f32 %v113_v53, 0.0  ;;  %v161_v3 = vmax.f32 %v154_v61, 0.0 }
  0xfa   :  { %v162_v63 = vpack.c.bf16 %v158_v56, %v158_v56  ;;  %v164_v5 = vpack.c.bf16 %v160_v0, %v160_v0 }
  0xfb   :  { %v163_v2 = vpack.c.bf16 %v159_v60, %v159_v60  ;;  %v165_v4 = vpack.c.bf16 %v161_v3, %v161_v3 }
  0xfd   :  { %454 = vmatprep.mubr.bf16.mxu0 %v163_v2  ;;  %494 = vmatprep.mubr.bf16.mxu1 %v165_v4 }
  0xfe   :  { %455 = vmatmul.mubr.bf16.vlgmr.msra.gmra.mrb[4].mxu0 %v162_v63  ;;  %495 = vmatmul.mubr.bf16.vlgmr.msra.gmra.mrb[4].mxu1 %v164_v5 }
 0x1d1   :  { %v570_v6 = vpop.f32.mrb[4].mxu0  ;;  %v592_v10 = vpop.f32.mrb[4].mxu1 }
 0x1d2   :  { %v571_v7 = vpop.f32.mrb[5].mxu0  ;;  %v593_v12 = vpop.f32.mrb[5].mxu1 }
 0x1d3   :  { %v572_v8 = vadd.f32 %v571_v7, %v570_v6  ;;  %v573_v9 = vpop.f32.mrb[6].mxu0  ;;  %v594_v13 = vadd.f32 %v593_v12, %v592_v10  ;;  %v595_v14 = vpop.f32.mrb[6].mxu1 }
 0x1d4   :  { %v574_v11 = vpop.f32.mrb[7].mxu0  ;;  %v596_v15 = vpop.f32.mrb[7].mxu1 }
 0x1d5   :  { %v497_v16 = vadd.f32 %v594_v13, %v572_v8 }
 0x1d7   :  { %502 = vst [vmem:[#allocation5] sm:$0xff] %v497_v16 }
 0x1d8   :  { %671 = shalt.err (!%p668_p12)
}
 0x1d9   :  { %s672_s10 = scalar_lea.hbm %s758_s4, 128 }
 0x1da   :  { %p673_p13 = scmp.ne.s32.totalorder %s758_s4, %s672_s10  ;;  %p676_p0 = scmp.lt.u32.totalorder %s672_s10, %s758_s4 }
 0x1dc   :  { %p678_p1 = pnand %p676_p0, %p673_p13 }
 0x1de   :  { %681 = shalt.err (!%p678_p1)
}
 0x1df   :  { %512 = dma.vmem_to_hbm [thread:$0]  %s510_s1, 128, %s758_s4, [#allocation4]  }
 0x1e0   :  { %684 = dma.done.wait [#allocation4], 128  }
 0x1e1   :  { %685 = vsyncadd [#allocation4], 4294967168 }
 0x1e2   :  { %516 = vsyncpa [#allocation3], 1 }
 0x1e3   :  { %517 = vsyncpa [#allocation4], 1 }

</bundles_post_ra>
